<compile_context>
chip_gen: v5e
topology: v5e:2x2
jax: 0.10.0
libtpu: 0.0.40
codegen_flags: <defaults>
</compile_context>

<pallas_src>
import jax
import jax.numpy as jnp
from jax.experimental import pallas as pl
from jax.experimental.pallas import tpu as pltpu

GROUP_NUM = 8      # stand-in for get_value('group_num')
ACT_LANES = 128    # lane-dense int32 slab width for the action output


def _block_skip_kernel(
    x_ref,       # (tb, C*HW) f32   flattened NCHW activations (this batch tile)
    h_ref,       # (tb, G)    f32   former_state
    wpe_ref,     # (C*HW, G)  f32   pool-folded embedding weight
    wih_ref,     # (2, G, 3G) f32   [0]=[w_ir|w_iz|w_in]  [1]=[w_hr|w_hz|w_hn]
    bias_ref,    # (1, 7G)    f32   [b_emb | b_ir b_iz b_in | b_hr b_hz b_hn]
    act_ref,     # (tb, 128)  int32 greedy action broadcast across lanes
    h_out_ref,   # (tb, G)    f32   new hidden state (aliases former_state in HBM)
):
    G = h_ref.shape[1]
    x = x_ref[...]                       # (tb, C*HW)
    h_prev = h_ref[...]                  # (tb, G)
    bias = bias_ref[...]                 # (1, 7G)

    b_emb = bias[:, 0:G]
    b_i = bias[:, G:4 * G]
    b_h = bias[:, 4 * G:7 * G]

    # --- avg_pool2d + embeddings[block_idx] fused into one K=C*HW matmul, then ReLU ---
    e = jnp.dot(x, wpe_ref[...], preferred_element_type=jnp.float32) + b_emb
    e = jnp.maximum(e, 0.0)              # (tb, G)

    # --- GRUCell(e, former_state): 2 packed matmuls + slices ---
    gi = jnp.dot(e, wih_ref[0], preferred_element_type=jnp.float32) + b_i        # (tb, 3G)
    gh = jnp.dot(h_prev, wih_ref[1], preferred_element_type=jnp.float32) + b_h   # (tb, 3G)

    r = jax.nn.sigmoid(gi[:, 0:G] + gh[:, 0:G])
    z = jax.nn.sigmoid(gi[:, G:2 * G] + gh[:, G:2 * G])
    n = jnp.tanh(gi[:, 2 * G:3 * G] + r * gh[:, 2 * G:3 * G])
    h_new = (1.0 - z) * n + z * h_prev                                            # (tb, G)

    h_out_ref[...] = h_new.astype(h_out_ref.dtype)

    # --- greedy_actions = argmax(h_state, dim=1) (first max, like torch) ---
    tb = h_new.shape[0]
    idx = jax.lax.broadcasted_iota(jnp.int32, (tb, G), 1)
    maxv = jnp.max(h_new, axis=-1, keepdims=True)
    cand = jnp.where(h_new == maxv, idx, jnp.int32(G))
    amax = jnp.min(cand, axis=-1, keepdims=True)                                  # (tb, 1)
    act_ref[...] = jnp.broadcast_to(amax, act_ref.shape).astype(act_ref.dtype)


def block_skip_forward(x, former_state, packed):
    """Eval-mode BlockSkip.forward. Returns (actions[int32,(B,)], h_state[(B,G)])."""
    B, C, H, W = x.shape
    G = former_state.shape[1]
    HW = H * W
    K = C * HW
    x2 = x.reshape(B, K)                 # glue reshape only (contiguous view)

    wpe = packed["w_pool_emb"]           # (C*HW, G)
    wih = packed["w_ih"]                 # (2, G, 3G)
    bias = packed["bias"]                # (1, 7G)

    # Batch tiling: <=128 rows per tile.  For B < 128 the block equals the full
    # batch dim (always legal); for B >= 128 the 128-row tile is 8-divisible and
    # any ragged final tile is handled by Pallas boundary masking.
    tb = min(B, 128)
    grid = (pl.cdiv(B, tb),)

    in_specs = [
        pl.BlockSpec((tb, K), lambda i: (i, 0)),
        pl.BlockSpec((tb, G), lambda i: (i, 0)),
        pl.BlockSpec(wpe.shape, lambda i: (0, 0)),       # grid-invariant: stays resident
        pl.BlockSpec(wih.shape, lambda i: (0, 0, 0)),    # grid-invariant: stays resident
        pl.BlockSpec(bias.shape, lambda i: (0, 0)),      # grid-invariant: stays resident
    ]
    out_specs = (
        pl.BlockSpec((tb, ACT_LANES), lambda i: (i, 0)),
        pl.BlockSpec((tb, G), lambda i: (i, 0)),
    )
    out_shape = (
        jax.ShapeDtypeStruct((B, ACT_LANES), jnp.int32),   # torch uses int64; int32 here
        jax.ShapeDtypeStruct((B, G), jnp.float32),
    )

    flops = 2 * B * K * G + 2 * (2 * B * G * 3 * G) + 12 * B * G
    transcendentals = 3 * B * G                              # 2 sigmoids + 1 tanh per gate col
    bytes_accessed = 4 * (B * K + 2 * B * G + K * G + 2 * G * 3 * G + 7 * G
                          + B * ACT_LANES + B * G)

    act_slab, h_state = pl.pallas_call(
        _block_skip_kernel,
        out_shape=out_shape,
        grid=grid,
        in_specs=in_specs,
        out_specs=out_specs,
        input_output_aliases={1: 1},     # former_state buffer reused for h_state
        compiler_params=pltpu.CompilerParams(
            dimension_semantics=("parallel",),
            vmem_limit_bytes=32 * 1024 * 1024,
        ),
        cost_estimate=pl.CostEstimate(
            flops=flops,
            transcendentals=transcendentals,
            bytes_accessed=bytes_accessed,
        ),
    )(x2, former_state, wpe, wih, bias)
    return act_slab[:, 0], h_state


def init_params(key, block_inplanes_list, group_num):
    """Deterministic synthetic init. Linear weights ~ N(0, 0.1) as in _initialize_weights.
    Weights are stored pre-transposed to (in, out)."""
    n_emb = len(block_inplanes_list)
    keys = jax.random.split(key, 2 * n_emb + 12)
    emb = []
    for i, c in enumerate(block_inplanes_list):
        w = 0.1 * jax.random.normal(keys[2 * i], (c, group_num), jnp.float32)
        b = 0.1 * jax.random.normal(keys[2 * i + 1], (group_num,), jnp.float32)
        emb.append((w, b))

    gk = keys[2 * n_emb:]

    def wmat(k):
        return 0.1 * jax.random.normal(k, (group_num, group_num), jnp.float32)

    def bvec(k):
        return 0.1 * jax.random.normal(k, (group_num,), jnp.float32)

    gru = {
        "w_ir": wmat(gk[0]), "w_iz": wmat(gk[1]), "w_in": wmat(gk[2]),
        "w_hr": wmat(gk[3]), "w_hz": wmat(gk[4]), "w_hn": wmat(gk[5]),
        "b_ir": bvec(gk[6]), "b_iz": bvec(gk[7]), "b_in": bvec(gk[8]),
        "b_hr": bvec(gk[9]), "b_hz": bvec(gk[10]), "b_hn": bvec(gk[11]),
    }
    return {"emb": emb, "gru": gru}


def pack_block_params(params, block_idx, hw):
    """One-time packing at parameter-load time: fold the avg-pool into the
    embedding weight and concatenate GRU weights/biases into 3 tensors."""
    w_emb, b_emb = params["emb"][block_idx]          # (C, G), (G,)
    gru = params["gru"]
    G = b_emb.shape[0]

    w_pool_emb = jnp.repeat(w_emb, hw, axis=0) * (1.0 / float(hw))          # (C*HW, G)
    w_i = jnp.concatenate([gru["w_ir"], gru["w_iz"], gru["w_in"]], axis=1)  # (G, 3G)
    w_h = jnp.concatenate([gru["w_hr"], gru["w_hz"], gru["w_hn"]], axis=1)  # (G, 3G)
    w_ih = jnp.stack([w_i, w_h], axis=0)                                    # (2, G, 3G)
    bias = jnp.concatenate([
        b_emb,
        gru["b_ir"], gru["b_iz"], gru["b_in"],
        gru["b_hr"], gru["b_hz"], gru["b_hn"],
    ]).reshape(1, 7 * G)                                                    # (1, 7G)
    return {"w_pool_emb": w_pool_emb, "w_ih": w_ih, "bias": bias}


if __name__ == "__main__":
    key = jax.random.PRNGKey(0)
    kx, kh, kp = jax.random.split(key, 3)

    block_inplanes_list = [4, 8]          # synthetic ResNet stage widths
    B, C, H, W = 2, 4, 16, 16             # NCHW, matches block_inplanes_list[0] == 4
    G = GROUP_NUM

    x = jax.random.normal(kx, (B, C, H, W), jnp.float32)
    former_state = jax.random.normal(kh, (B, G), jnp.float32)
    params = init_params(kp, block_inplanes_list, G)
    packed = pack_block_params(params, block_idx=0, hw=H * W)   # once, at load time

    fwd = jax.jit(block_skip_forward)
    actions, h_state = fwd(x, former_state, packed)
    jax.block_until_ready((actions, h_state))

    assert actions.shape == (B,) and actions.dtype == jnp.int32
    assert h_state.shape == (B, G)

    # Pure-JAX reference (nn.Linear / nn.GRUCell semantics) for a sanity check.
    ss = jnp.mean(x.reshape(B, C, H * W), axis=-1)
    w_emb, b_emb = params["emb"][0]
    e = jnp.maximum(ss @ w_emb + b_emb, 0.0)
    gru = params["gru"]
    r = jax.nn.sigmoid(e @ gru["w_ir"] + gru["b_ir"] + former_state @ gru["w_hr"] + gru["b_hr"])
    z = jax.nn.sigmoid(e @ gru["w_iz"] + gru["b_iz"] + former_state @ gru["w_hz"] + gru["b_hz"])
    n = jnp.tanh(e @ gru["w_in"] + gru["b_in"] + r * (former_state @ gru["w_hn"] + gru["b_hn"]))
    h_ref = (1.0 - z) * n + z * former_state
    assert jnp.allclose(h_state, h_ref, rtol=1e-3, atol=1e-3)
    assert jnp.array_equal(actions, jnp.argmax(h_state, axis=1).astype(jnp.int32))

    print("KERNEL_OK")
</pallas_src>

<mosaic_0001>
module attributes {stable_mosaic.version = 11 : i64} {
  func.func @_block_skip_kernel(%arg0: i32, %arg1: memref<2x1024xf32, #tpu.memory_space<vmem>>, %arg2: memref<2x8xf32, #tpu.memory_space<vmem>>, %arg3: memref<1024x8xf32, #tpu.memory_space<vmem>>, %arg4: memref<2x8x24xf32, #tpu.memory_space<vmem>>, %arg5: memref<1x56xf32, #tpu.memory_space<vmem>>, %arg6: memref<2x128xi32, #tpu.memory_space<vmem>>, %arg7: memref<2x8xf32, #tpu.memory_space<vmem>>) attributes {dimension_semantics = [#tpu.dimension_semantics<parallel>], iteration_bounds = array<i64: 1>, scalar_prefetch = 0 : i64, scratch_operands = 0 : i64, tpu.core_type = #tpu.core_type<tc>, window_params = [{transform_indices = @transform_0, window_bounds = array<i64: 2, 1024>}, {transform_indices = @transform_1, window_bounds = array<i64: 2, 8>}, {pipeline_mode = #tpu.pipeline_mode<synchronous>, transform_indices = @transform_2, window_bounds = array<i64: 1024, 8>}, {pipeline_mode = #tpu.pipeline_mode<synchronous>, transform_indices = @transform_3, window_bounds = array<i64: 2, 8, 24>}, {pipeline_mode = #tpu.pipeline_mode<synchronous>, transform_indices = @transform_4, window_bounds = array<i64: 1, 56>}, {transform_indices = @transform_5, window_bounds = array<i64: 2, 128>}, {transform_indices = @transform_6, window_bounds = array<i64: 2, 8>}]} {
    %c0 = arith.constant 0 : index
    %c0_0 = arith.constant 0 : index
    %0 = vector.load %arg1[%c0, %c0_0] : memref<2x1024xf32, #tpu.memory_space<vmem>>, vector<2x1024xf32>
    %c0_1 = arith.constant 0 : index
    %c0_2 = arith.constant 0 : index
    %1 = vector.load %arg2[%c0_1, %c0_2] : memref<2x8xf32, #tpu.memory_space<vmem>>, vector<2x8xf32>
    %c0_3 = arith.constant 0 : index
    %c0_4 = arith.constant 0 : index
    %2 = vector.load %arg5[%c0_3, %c0_4] : memref<1x56xf32, #tpu.memory_space<vmem>>, vector<1x56xf32>
    %3 = vector.extract_strided_slice %2 {offsets = [0, 0], sizes = [1, 8], strides = [1, 1]} : vector<1x56xf32> to vector<1x8xf32>
    %4 = vector.extract_strided_slice %2 {offsets = [0, 8], sizes = [1, 24], strides = [1, 1]} : vector<1x56xf32> to vector<1x24xf32>
    %5 = vector.extract_strided_slice %2 {offsets = [0, 32], sizes = [1, 24], strides = [1, 1]} : vector<1x56xf32> to vector<1x24xf32>
    %c0_5 = arith.constant 0 : index
    %c0_6 = arith.constant 0 : index
    %6 = vector.load %arg3[%c0_5, %c0_6] : memref<1024x8xf32, #tpu.memory_space<vmem>>, vector<1024x8xf32>
    %cst = arith.constant dense<0.000000e+00> : vector<2x8xf32>
    %7 = tpu.matmul %0, %6, %cst {dimension_numbers = #tpu.dot_dimension_numbers<[1], [0], [0], [1], [0, 0, 1, 1], [], []>} : vector<2x1024xf32>, vector<1024x8xf32>, vector<2x8xf32> -> vector<2x8xf32>
    %8 = vector.broadcast %3 : vector<1x8xf32> to vector<2x8xf32>
    %9 = arith.addf %7, %8 : vector<2x8xf32>
    %cst_7 = arith.constant 0.000000e+00 : f32
    %10 = vector.broadcast %cst_7 : f32 to vector<2x8xf32>
    %11 = arith.maximumf %9, %10 : vector<2x8xf32>
    %c0_8 = arith.constant 0 : index
    %c0_9 = arith.constant 0 : index
    %c0_10 = arith.constant 0 : index
    %12 = vector.load %arg4[%c0_8, %c0_9, %c0_10] : memref<2x8x24xf32, #tpu.memory_space<vmem>>, vector<1x8x24xf32>
    %13 = vector.shape_cast %12 : vector<1x8x24xf32> to vector<8x24xf32>
    %cst_11 = arith.constant dense<0.000000e+00> : vector<2x24xf32>
    %14 = tpu.matmul %11, %13, %cst_11 {dimension_numbers = #tpu.dot_dimension_numbers<[1], [0], [0], [1], [0, 0, 1, 1], [], []>} : vector<2x8xf32>, vector<8x24xf32>, vector<2x24xf32> -> vector<2x24xf32>
    %15 = vector.broadcast %4 : vector<1x24xf32> to vector<2x24xf32>
    %16 = arith.addf %14, %15 : vector<2x24xf32>
    %c1 = arith.constant 1 : index
    %c0_12 = arith.constant 0 : index
    %c0_13 = arith.constant 0 : index
    %17 = vector.load %arg4[%c1, %c0_12, %c0_13] : memref<2x8x24xf32, #tpu.memory_space<vmem>>, vector<1x8x24xf32>
    %18 = vector.shape_cast %17 : vector<1x8x24xf32> to vector<8x24xf32>
    %cst_14 = arith.constant dense<0.000000e+00> : vector<2x24xf32>
    %19 = tpu.matmul %1, %18, %cst_14 {dimension_numbers = #tpu.dot_dimension_numbers<[1], [0], [0], [1], [0, 0, 1, 1], [], []>} : vector<2x8xf32>, vector<8x24xf32>, vector<2x24xf32> -> vector<2x24xf32>
    %20 = vector.broadcast %5 : vector<1x24xf32> to vector<2x24xf32>
    %21 = arith.addf %19, %20 : vector<2x24xf32>
    %22 = vector.extract_strided_slice %16 {offsets = [0, 0], sizes = [2, 8], strides = [1, 1]} : vector<2x24xf32> to vector<2x8xf32>
    %23 = vector.extract_strided_slice %21 {offsets = [0, 0], sizes = [2, 8], strides = [1, 1]} : vector<2x24xf32> to vector<2x8xf32>
    %24 = arith.addf %22, %23 : vector<2x8xf32>
    %25 = arith.negf %24 : vector<2x8xf32>
    %26 = math.exp %25 : vector<2x8xf32>
    %cst_15 = arith.constant 1.000000e+00 : f32
    %27 = vector.broadcast %cst_15 : f32 to vector<2x8xf32>
    %28 = arith.addf %27, %26 : vector<2x8xf32>
    %29 = arith.divf %27, %28 : vector<2x8xf32>
    %30 = vector.extract_strided_slice %16 {offsets = [0, 8], sizes = [2, 8], strides = [1, 1]} : vector<2x24xf32> to vector<2x8xf32>
    %31 = vector.extract_strided_slice %21 {offsets = [0, 8], sizes = [2, 8], strides = [1, 1]} : vector<2x24xf32> to vector<2x8xf32>
    %32 = arith.addf %30, %31 : vector<2x8xf32>
    %33 = arith.negf %32 : vector<2x8xf32>
    %34 = math.exp %33 : vector<2x8xf32>
    %cst_16 = arith.constant 1.000000e+00 : f32
    %35 = vector.broadcast %cst_16 : f32 to vector<2x8xf32>
    %36 = arith.addf %35, %34 : vector<2x8xf32>
    %37 = arith.divf %35, %36 : vector<2x8xf32>
    %38 = vector.extract_strided_slice %16 {offsets = [0, 16], sizes = [2, 8], strides = [1, 1]} : vector<2x24xf32> to vector<2x8xf32>
    %39 = vector.extract_strided_slice %21 {offsets = [0, 16], sizes = [2, 8], strides = [1, 1]} : vector<2x24xf32> to vector<2x8xf32>
    %40 = arith.mulf %29, %39 : vector<2x8xf32>
    %41 = arith.addf %38, %40 : vector<2x8xf32>
    %42 = math.tanh %41 : vector<2x8xf32>
    %cst_17 = arith.constant 1.000000e+00 : f32
    %43 = vector.broadcast %cst_17 : f32 to vector<2x8xf32>
    %44 = arith.subf %43, %37 : vector<2x8xf32>
    %45 = arith.mulf %44, %42 : vector<2x8xf32>
    %46 = arith.mulf %37, %1 : vector<2x8xf32>
    %47 = arith.addf %45, %46 : vector<2x8xf32>
    %c0_18 = arith.constant 0 : index
    %c0_19 = arith.constant 0 : index
    %48 = vector.load %arg7[%c0_18, %c0_19] : memref<2x8xf32, #tpu.memory_space<vmem>>, vector<2x8xf32>
    tpu.vector_store %arg7[%c0_18, %c0_19], %47 {strides = array<i32>} : memref<2x8xf32, #tpu.memory_space<vmem>>, vector<2x8xf32>,
    %49 = tpu.iota {dimensions = array<i32: 1>} : vector<2x8xi32>
    %cst_20 = arith.constant dense<0xFF800000> : vector<2xf32>
    %50 = vector.multi_reduction <maximumf>, %47, %cst_20 [1] : vector<2x8xf32> to vector<2xf32>
    %51 = vector.shape_cast %50 : vector<2xf32> to vector<2x1xf32>
    %52 = vector.broadcast %51 : vector<2x1xf32> to vector<2x8xf32>
    %53 = arith.cmpf oeq, %47, %52 : vector<2x8xf32>
    %c8_i32 = arith.constant 8 : i32
    %54 = vector.broadcast %c8_i32 : i32 to vector<2x8xi32>
    %55 = arith.select %53, %49, %54 : vector<2x8xi1>, vector<2x8xi32>
    %cst_21 = arith.constant dense<2147483647> : vector<2xi32>
    %56 = vector.multi_reduction <minsi>, %55, %cst_21 [1] : vector<2x8xi32> to vector<2xi32>
    %57 = vector.shape_cast %56 : vector<2xi32> to vector<2x1xi32>
    %58 = vector.shape_cast %57 : vector<2x1xi32> to vector<2x1xi32>
    %59 = vector.broadcast %58 : vector<2x1xi32> to vector<2x128xi32>
    %c0_22 = arith.constant 0 : index
    %c0_23 = arith.constant 0 : index
    %60 = vector.load %arg6[%c0_22, %c0_23] : memref<2x128xi32, #tpu.memory_space<vmem>>, vector<2x128xi32>
    tpu.vector_store %arg6[%c0_22, %c0_23], %59 {strides = array<i32>} : memref<2x128xi32, #tpu.memory_space<vmem>>, vector<2x128xi32>,
    return
  }
  func.func @transform_0(%arg0: i32) -> (i32, i32) {
    %c0_i32 = arith.constant 0 : i32
    %c0_i32_0 = arith.constant 0 : i32
    return %arg0, %c0_i32 : i32, i32
  }
  func.func @transform_1(%arg0: i32) -> (i32, i32) {
    %c0_i32 = arith.constant 0 : i32
    %c0_i32_0 = arith.constant 0 : i32
    return %arg0, %c0_i32 : i32, i32
  }
  func.func @transform_2(%arg0: i32) -> (i32, i32) {
    %c0_i32 = arith.constant 0 : i32
    %c0_i32_0 = arith.constant 0 : i32
    %c0_i32_1 = arith.constant 0 : i32
    return %c0_i32, %c0_i32_0 : i32, i32
  }
  func.func @transform_3(%arg0: i32) -> (i32, i32, i32) {
    %c0_i32 = arith.constant 0 : i32
    %c0_i32_0 = arith.constant 0 : i32
    %c0_i32_1 = arith.constant 0 : i32
    %c0_i32_2 = arith.constant 0 : i32
    return %c0_i32, %c0_i32_0, %c0_i32_1 : i32, i32, i32
  }
  func.func @transform_4(%arg0: i32) -> (i32, i32) {
    %c0_i32 = arith.constant 0 : i32
    %c0_i32_0 = arith.constant 0 : i32
    %c0_i32_1 = arith.constant 0 : i32
    return %c0_i32, %c0_i32_0 : i32, i32
  }
  func.func @transform_5(%arg0: i32) -> (i32, i32) {
    %c0_i32 = arith.constant 0 : i32
    %c0_i32_0 = arith.constant 0 : i32
    return %arg0, %c0_i32 : i32, i32
  }
  func.func @transform_6(%arg0: i32) -> (i32, i32) {
    %c0_i32 = arith.constant 0 : i32
    %c0_i32_0 = arith.constant 0 : i32
    return %arg0, %c0_i32 : i32, i32
  }
}

</mosaic_0001>

<bundles_post_ra>
// kernel: block_skip_forward.1
= control target key start
LH: loop header
LB: loop body
LE: loop exit
PB: predicated region body
PF: predicated region fallthrough
CT: control target
= control target key end

     0   :  { %vm343_vm0 = vcmask 64512   ;;  %s497_s21 = smov 8   ;;  %vm445_vm5 = vcmask 123968   ;;  %vm441_vm8 = vcmask 58368   ;;  %s946_s2 = inlined_call_operand.vmem [shape: f32[1024,8], index: 2, kind: input, shape index: {}]   ;;  %s947_s0 = inlined_call_operand.vmem [shape: f32[2,1024], index: 0, kind: input, shape index: {}]   ;;  %s948_s4 = inlined_call_operand.vmem [shape: f32[1,56], index: 4, kind: input, shape index: {}]   ;;  %s949_s3 = inlined_call_operand.vmem [shape: f32[2,8,24], index: 3, kind: input, shape index: {}]   ;;  %s950_s1 = inlined_call_operand.vmem [shape: f32[2,8], index: 1, kind: input, shape index: {}, may-alias: {1,6}]   ;;  %s951_s6 = inlined_call_operand.vmem [shape: f32[2,8], index: 6, kind: output, shape index: {1}, may-alias: {1,6}]   ;;  %s952_s5 = inlined_call_operand.vmem [shape: s32[2,128], index: 5, kind: output, shape index: {0}]  }
   0x1   :  { %v73_v0 = vld [vmem:[%s946_s2 + $0x178] sm:$0xff]  ;;  %v72_v2 = vld [vmem:[%s946_s2 + $0x170] sm:$0xff]  ;;  %v71_v6 = vld [vmem:[%s946_s2 + $0x168] sm:$0xff] }
   0x2   :  { %v41_v1 = vld [vmem:[%s946_s2 + $0x78] sm:$0xff]  ;;  %218 = vmatpush.msra.mxu2 %v73_v0  ;;  %v40_v4 = vld [vmem:[%s946_s2 + $0x70] sm:$0xff]  ;;  %v39_v8 = vld [vmem:[%s946_s2 + $0x68] sm:$0xff] }
   0x3   :  { %178 = vmatpush.msra.mxu0 %v41_v1  ;;  %v89_v3 = vld [vmem:[%s946_s2 + $0x1f8] sm:$0xff]  ;;  %v88_v7 = vld [vmem:[%s946_s2 + $0x1f0] sm:$0xff]  ;;  %v87_v10 = vld [vmem:[%s946_s2 + $0x1e8] sm:$0xff] }
   0x4   :  { %v57_v5 = vld [vmem:[%s946_s2 + $0xf8] sm:$0xff]  ;;  %238 = vmatpush.msra.mxu3 %v89_v3  ;;  %219 = vmatpush.msra.mxu2 %v72_v2  ;;  %v56_v9 = vld [vmem:[%s946_s2 + $0xf0] sm:$0xff]  ;;  %v70_v11 = vld [vmem:[%s946_s2 + $0x160] sm:$0xff] }
   0x5   :  { %198 = vmatpush.msra.mxu1 %v57_v5  ;;  %179 = vmatpush.msra.mxu0 %v40_v4  ;;  %v38_v12 = vld [vmem:[%s946_s2 + $0x60] sm:$0xff]  ;;  %v55_v13 = vld [vmem:[%s946_s2 + $0xe8] sm:$0xff]  ;;  %v69_v16 = vld [vmem:[%s946_s2 + $0x158] sm:$0xff] }
   0x6   :  { %239 = vmatpush.msra.mxu3 %v88_v7  ;;  %220 = vmatpush.msra.mxu2 %v71_v6  ;;  %v86_v14 = vld [vmem:[%s946_s2 + $0x1e0] sm:$0xff]  ;;  %v37_v17 = vld [vmem:[%s946_s2 + $0x58] sm:$0xff]  ;;  %v68_v20 = vld [vmem:[%s946_s2 + $0x150] sm:$0xff] }
   0x7   :  { %199 = vmatpush.msra.mxu1 %v56_v9  ;;  %180 = vmatpush.msra.mxu0 %v39_v8  ;;  %v54_v15 = vld [vmem:[%s946_s2 + $0xe0] sm:$0xff]  ;;  %v85_v18 = vld [vmem:[%s946_s2 + $0x1d8] sm:$0xff]  ;;  %v36_v21 = vld [vmem:[%s946_s2 + $0x50] sm:$0xff] }
   0x8   :  { %240 = vmatpush.msra.mxu3 %v87_v10  ;;  %221 = vmatpush.msra.mxu2 %v70_v11  ;;  %v53_v19 = vld [vmem:[%s946_s2 + $0xd8] sm:$0xff]  ;;  %v84_v22 = vld [vmem:[%s946_s2 + $0x1d0] sm:$0xff]  ;;  %v67_v24 = vld [vmem:[%s946_s2 + $0x148] sm:$0xff] }
   0x9   :  { %200 = vmatpush.msra.mxu1 %v55_v13  ;;  %181 = vmatpush.msra.mxu0 %v38_v12  ;;  %v52_v23 = vld [vmem:[%s946_s2 + $0xd0] sm:$0xff]  ;;  %v35_v25 = vld [vmem:[%s946_s2 + $0x48] sm:$0xff]  ;;  %v66_v28 = vld [vmem:[%s946_s2 + $0x140] sm:$0xff] }
   0xa   :  { %241 = vmatpush.msra.mxu3 %v86_v14  ;;  %222 = vmatpush.msra.mxu2 %v69_v16  ;;  %v83_v26 = vld [vmem:[%s946_s2 + $0x1c8] sm:$0xff]  ;;  %v34_v29 = vld [vmem:[%s946_s2 + $0x40] sm:$0xff]  ;;  %v65_v32 = vld [vmem:[%s946_s2 + $0x138] sm:$0xff] }
   0xb   :  { %201 = vmatpush.msra.mxu1 %v54_v15  ;;  %182 = vmatpush.msra.mxu0 %v37_v17  ;;  %v51_v27 = vld [vmem:[%s946_s2 + $0xc8] sm:$0xff]  ;;  %v82_v30 = vld [vmem:[%s946_s2 + $0x1c0] sm:$0xff]  ;;  %v33_v33 = vld [vmem:[%s946_s2 + $0x38] sm:$0xff] }
   0xc   :  { %242 = vmatpush.msra.mxu3 %v85_v18  ;;  %223 = vmatpush.msra.mxu2 %v68_v20  ;;  %v50_v31 = vld [vmem:[%s946_s2 + $0xc0] sm:$0xff]  ;;  %v81_v34 = vld [vmem:[%s946_s2 + $0x1b8] sm:$0xff]  ;;  %v64_v36 = vld [vmem:[%s946_s2 + $0x130] sm:$0xff] }
   0xd   :  { %202 = vmatpush.msra.mxu1 %v53_v19  ;;  %183 = vmatpush.msra.mxu0 %v36_v21  ;;  %v49_v35 = vld [vmem:[%s946_s2 + $0xb8] sm:$0xff]  ;;  %v32_v37 = vld [vmem:[%s946_s2 + $0x30] sm:$0xff]  ;;  %v63_v40 = vld [vmem:[%s946_s2 + $0x128] sm:$0xff] }
   0xe   :  { %243 = vmatpush.msra.mxu3 %v84_v22  ;;  %224 = vmatpush.msra.mxu2 %v67_v24  ;;  %v80_v38 = vld [vmem:[%s946_s2 + $0x1b0] sm:$0xff]  ;;  %v31_v41 = vld [vmem:[%s946_s2 + $0x28] sm:$0xff]  ;;  %v62_v44 = vld [vmem:[%s946_s2 + $0x120] sm:$0xff] }
   0xf   :  { %203 = vmatpush.msra.mxu1 %v52_v23  ;;  %184 = vmatpush.msra.mxu0 %v35_v25  ;;  %v48_v39 = vld [vmem:[%s946_s2 + $0xb0] sm:$0xff]  ;;  %v79_v42 = vld [vmem:[%s946_s2 + $0x1a8] sm:$0xff]  ;;  %v30_v45 = vld [vmem:[%s946_s2 + $0x20] sm:$0xff] }
  0x10   :  { %244 = vmatpush.msra.mxu3 %v83_v26  ;;  %225 = vmatpush.msra.mxu2 %v66_v28  ;;  %v47_v43 = vld [vmem:[%s946_s2 + $0xa8] sm:$0xff]  ;;  %v78_v46 = vld [vmem:[%s946_s2 + $0x1a0] sm:$0xff]  ;;  %v61_v48 = vld [vmem:[%s946_s2 + $0x118] sm:$0xff] }
  0x11   :  { %204 = vmatpush.msra.mxu1 %v51_v27  ;;  %185 = vmatpush.msra.mxu0 %v34_v29  ;;  %v46_v47 = vld [vmem:[%s946_s2 + $0xa0] sm:$0xff]  ;;  %v29_v49 = vld [vmem:[%s946_s2 + $0x18] sm:$0xff]  ;;  %v60_v52 = vld [vmem:[%s946_s2 + $0x110] sm:$0xff] }
  0x12   :  { %245 = vmatpush.msra.mxu3 %v82_v30  ;;  %226 = vmatpush.msra.mxu2 %v65_v32  ;;  %v77_v50 = vld [vmem:[%s946_s2 + $0x198] sm:$0xff]  ;;  %v28_v53 = vld [vmem:[%s946_s2 + $0x10] sm:$0xff]  ;;  %v59_v56 = vld [vmem:[%s946_s2 + $0x108] sm:$0xff] }
  0x13   :  { %205 = vmatpush.msra.mxu1 %v50_v31  ;;  %186 = vmatpush.msra.mxu0 %v33_v33  ;;  %v45_v51 = vld [vmem:[%s946_s2 + $0x98] sm:$0xff]  ;;  %v76_v54 = vld [vmem:[%s946_s2 + $0x190] sm:$0xff]  ;;  %v27_v57 = vld [vmem:[%s946_s2 + $0x8] sm:$0xff] }
  0x14   :  { %246 = vmatpush.msra.mxu3 %v81_v34  ;;  %227 = vmatpush.msra.mxu2 %v64_v36  ;;  %v44_v55 = vld [vmem:[%s946_s2 + $0x90] sm:$0xff]  ;;  %v75_v58 = vld [vmem:[%s946_s2 + $0x188] sm:$0xff]  ;;  %v58_v60 = vld [vmem:[%s946_s2 + $0x100] sm:$0xff] }
  0x15   :  { %206 = vmatpush.msra.mxu1 %v49_v35  ;;  %187 = vmatpush.msra.mxu0 %v32_v37  ;;  %v43_v59 = vld [vmem:[%s946_s2 + $0x88] sm:$0xff]  ;;  %v26_v61 = vld [vmem:[%s946_s2] sm:$0xff]  ;;  %v137_v62 = vld [vmem:[%s946_s2 + $0x378] sm:$0xff] }
  0x16   :  { %247 = vmatpush.msra.mxu3 %v80_v38  ;;  %228 = vmatpush.msra.mxu2 %v63_v40  ;;  %v74_v63 = vld [vmem:[%s946_s2 + $0x180] sm:$0xff]  ;;  %v105_v0 = vld [vmem:[%s946_s2 + $0x278] sm:$0xff]  ;;  %v136_v2 = vld [vmem:[%s946_s2 + $0x370] sm:$0xff] }
  0x17   :  { %207 = vmatpush.msra.mxu1 %v48_v39  ;;  %188 = vmatpush.msra.mxu0 %v31_v41  ;;  %v153_v1 = vld [vmem:[%s946_s2 + $0x3f8] sm:$0xff]  ;;  %v42_v3 = vld [vmem:[%s946_s2 + $0x80] sm:$0xff]  ;;  %v104_v4 = vld [vmem:[%s946_s2 + $0x270] sm:$0xff] }
  0x18   :  { %248 = vmatpush.msra.mxu3 %v79_v42  ;;  %229 = vmatpush.msra.mxu2 %v62_v44  ;;  %v121_v5 = vld [vmem:[%s946_s2 + $0x2f8] sm:$0xff]  ;;  %v135_v6 = vld [vmem:[%s946_s2 + $0x368] sm:$0xff]  ;;  %v152_v7 = vld [vmem:[%s946_s2 + $0x3f0] sm:$0xff] }
  0x19   :  { %208 = vmatpush.msra.mxu1 %v47_v43  ;;  %189 = vmatpush.msra.mxu0 %v30_v45  ;;  %v103_v8 = vld [vmem:[%s946_s2 + $0x268] sm:$0xff]  ;;  %v120_v9 = vld [vmem:[%s946_s2 + $0x2f0] sm:$0xff]  ;;  %v134_v10 = vld [vmem:[%s946_s2 + $0x360] sm:$0xff] }
  0x1a   :  { %249 = vmatpush.msra.mxu3 %v78_v46  ;;  %230 = vmatpush.msra.mxu2 %v61_v48  ;;  %v151_v11 = vld [vmem:[%s946_s2 + $0x3e8] sm:$0xff]  ;;  %v102_v12 = vld [vmem:[%s946_s2 + $0x260] sm:$0xff]  ;;  %v133_v15 = vld [vmem:[%s946_s2 + $0x358] sm:$0xff] }
  0x1b   :  { %209 = vmatpush.msra.mxu1 %v46_v47  ;;  %190 = vmatpush.msra.mxu0 %v29_v49  ;;  %v119_v13 = vld [vmem:[%s946_s2 + $0x2e8] sm:$0xff]  ;;  %v22_v14 = vld [vmem:[%s947_s0] sm:$0xff]  ;;  %v101_v17 = vld [vmem:[%s946_s2 + $0x258] sm:$0xff] }
  0x1c   :  { %250 = vmatpush.msra.mxu3 %v77_v50  ;;  %231 = vmatpush.msra.mxu2 %v60_v52  ;;  %v150_v16 = vld [vmem:[%s946_s2 + $0x3e0] sm:$0xff]  ;;  %159 = vst [vmem:[#allocation1] ss:$4 sm:$0xff] %v22_v14  ;;  %v132_v19 = vld [vmem:[%s946_s2 + $0x350] sm:$0xff]  ;;  %v149_v20 = vld [vmem:[%s946_s2 + $0x3d8] sm:$0xff] }
  0x1d   :  { %210 = vmatpush.msra.mxu1 %v45_v51  ;;  %191 = vmatpush.msra.mxu0 %v28_v53  ;;  %v118_v18 = vld [vmem:[%s946_s2 + $0x2e0] sm:$0xff]  ;;  %v100_v21 = vld [vmem:[%s946_s2 + $0x250] sm:$0xff]  ;;  %v117_v22 = vld [vmem:[%s946_s2 + $0x2d8] sm:$0xff] }
  0x1e   :  { %251 = vmatpush.msra.mxu3 %v76_v54  ;;  %232 = vmatpush.msra.mxu2 %v59_v56  ;;  %v131_v23 = vld [vmem:[%s946_s2 + $0x348] sm:$0xff]  ;;  %v148_v24 = vld [vmem:[%s946_s2 + $0x3d0] sm:$0xff]  ;;  %v130_v28 = vld [vmem:[%s946_s2 + $0x340] sm:$0xff] }
  0x1f   :  { %211 = vmatpush.msra.mxu1 %v44_v55  ;;  %192 = vmatpush.msra.mxu0 %v27_v57  ;;  %v23_v25 = vld [vmem:[%s947_s0 + $0x8] sm:$0xff]  ;;  %v116_v27 = vld [vmem:[%s946_s2 + $0x2d0] sm:$0xff]  ;;  %v98_v30 = vld [vmem:[%s946_s2 + $0x240] sm:$0xff] }
  0x20   :  { %252 = vmatpush.msra.mxu3 %v75_v58  ;;  %233 = vmatpush.msra.mxu2 %v58_v60  ;;  %v99_v26 = vld [vmem:[%s946_s2 + $0x248] sm:$0xff]  ;;  %161 = vst [vmem:[#allocation1 + $0x20] ss:$4 sm:$0xff] %v23_v25  ;;  %v129_v32 = vld [vmem:[%s946_s2 + $0x338] sm:$0xff]  ;;  %v146_v33 = vld [vmem:[%s946_s2 + $0x3c0] sm:$0xff] }
  0x21   :  { %212 = vmatpush.msra.mxu1 %v43_v59  ;;  %193 = vmatpush.msra.mxu0 %v26_v61  ;;  %v147_v29 = vld [vmem:[%s946_s2 + $0x3c8] sm:$0xff]  ;;  %v97_v34 = vld [vmem:[%s946_s2 + $0x238] sm:$0xff]  ;;  %v114_v35 = vld [vmem:[%s946_s2 + $0x2c0] sm:$0xff] }
  0x22   :  { %298 = vmatpush.msrb.mxu2 %v137_v62  ;;  %253 = vmatpush.msra.mxu3 %v74_v63  ;;  %v115_v31 = vld [vmem:[%s946_s2 + $0x2c8] sm:$0xff]  ;;  %v128_v36 = vld [vmem:[%s946_s2 + $0x330] sm:$0xff]  ;;  %v145_v37 = vld [vmem:[%s946_s2 + $0x3b8] sm:$0xff] }
  0x23   :  { %258 = vmatpush.msrb.mxu0 %v105_v0  ;;  %213 = vmatpush.msra.mxu1 %v42_v3  ;;  %v96_v38 = vld [vmem:[%s946_s2 + $0x230] sm:$0xff]  ;;  %v113_v39 = vld [vmem:[%s946_s2 + $0x2b8] sm:$0xff]  ;;  %v127_v40 = vld [vmem:[%s946_s2 + $0x328] sm:$0xff] }
  0x24   :  { %318 = vmatpush.msrb.mxu3 %v153_v1  ;;  %299 = vmatpush.msrb.mxu2 %v136_v2  ;;  %v144_v41 = vld [vmem:[%s946_s2 + $0x3b0] sm:$0xff]  ;;  %v95_v42 = vld [vmem:[%s946_s2 + $0x228] sm:$0xff]  ;;  %v126_v44 = vld [vmem:[%s946_s2 + $0x320] sm:$0xff] }
  0x25   :  { %259 = vmatpush.msrb.mxu0 %v104_v4  ;;  %278 = vmatpush.msrb.mxu1 %v121_v5  ;;  %v112_v43 = vld [vmem:[%s946_s2 + $0x2b0] sm:$0xff]  ;;  %v143_v45 = vld [vmem:[%s946_s2 + $0x3a8] sm:$0xff]  ;;  %v94_v47 = vld [vmem:[%s946_s2 + $0x220] sm:$0xff] }
  0x26   :  { %300 = vmatpush.msrb.mxu2 %v135_v6  ;;  %319 = vmatpush.msrb.mxu3 %v152_v7  ;;  %v164_v46 = vld.sshfl [vmem:[#allocation1 + $0x10] sm:$0xff pattern:$0x73625140]  ;;  %v111_v48 = vld [vmem:[%s946_s2 + $0x2a8] sm:$0xff]  ;;  %v125_v49 = vld [vmem:[%s946_s2 + $0x318] sm:$0xff] }
  0x27   :  { %260 = vmatpush.msrb.mxu0 %v103_v8  ;;  %279 = vmatpush.msrb.mxu1 %v120_v9  ;;  %v142_v50 = vld [vmem:[%s946_s2 + $0x3a0] sm:$0xff]  ;;  %v165_v52 = vld.sshfl [vmem:[#allocation1 + $0x18] sm:$0xff pattern:$0x73625140]  ;;  %v124_v55 = vld [vmem:[%s946_s2 + $0x310] sm:$0xff] }
  0x28   :  { %301 = vmatpush.msrb.mxu2 %v134_v10  ;;  %320 = vmatpush.msrb.mxu3 %v151_v11  ;;  %v162_v51 = vld.sshfl [vmem:[#allocation1] sm:$0xff pattern:$0x73625140]  ;;  %v93_v53 = vld [vmem:[%s946_s2 + $0x218] sm:$0xff]  ;;  %v92_v58 = vld [vmem:[%s946_s2 + $0x210] sm:$0xff] }
  0x29   :  { %261 = vmatpush.msrb.mxu0 %v102_v12  ;;  %280 = vmatpush.msrb.mxu1 %v119_v13  ;;  %v110_v54 = vld [vmem:[%s946_s2 + $0x2a0] sm:$0xff]  ;;  %v141_v56 = vld [vmem:[%s946_s2 + $0x398] sm:$0xff]  ;;  %v163_v57 = vld.sshfl [vmem:[#allocation1 + $0x8] sm:$0xff pattern:$0x73625140] }
  0x2a   :  { %302 = vmatpush.msrb.mxu2 %v133_v15  ;;  %321 = vmatpush.msrb.mxu3 %v150_v16  ;;  %v109_v59 = vld [vmem:[%s946_s2 + $0x298] sm:$0xff]  ;;  %v123_v60 = vld [vmem:[%s946_s2 + $0x308] sm:$0xff]  ;;  %v140_v61 = vld [vmem:[%s946_s2 + $0x390] sm:$0xff] }
  0x2b   :  { %262 = vmatpush.msrb.mxu0 %v101_v17  ;;  %281 = vmatpush.msrb.mxu1 %v118_v18  ;;  %v91_v62 = vld [vmem:[%s946_s2 + $0x208] sm:$0xff]  ;;  %v108_v63 = vld [vmem:[%s946_s2 + $0x290] sm:$0xff]  ;;  %v122_v0 = vld [vmem:[%s946_s2 + $0x300] sm:$0xff] }
  0x2c   :  { %303 = vmatpush.msrb.mxu2 %v132_v19  ;;  %322 = vmatpush.msrb.mxu3 %v149_v20  ;;  %v139_v1 = vld [vmem:[%s946_s2 + $0x388] sm:$0xff]  ;;  %v168_v2 = vld.sshfl [vmem:[#allocation1 + $0x30] sm:$0xff pattern:$0x73625140]  ;;  %v90_v3 = vld [vmem:[%s946_s2 + $0x200] sm:$0xff] }
  0x2d   :  { %263 = vmatpush.msrb.mxu0 %v100_v21  ;;  %282 = vmatpush.msrb.mxu1 %v117_v22  ;;  %v107_v4 = vld [vmem:[%s946_s2 + $0x288] sm:$0xff]  ;;  %v138_v5 = vld [vmem:[%s946_s2 + $0x380] sm:$0xff]  ;;  %v169_v8 = vld.sshfl [vmem:[#allocation1 + $0x38] sm:$0xff pattern:$0x73625140] }
  0x2e   :  { %304 = vmatpush.msrb.mxu2 %v131_v23  ;;  %323 = vmatpush.msrb.mxu3 %v148_v24  ;;  %v486_v6 = vld [vmem:[%s948_s4] ss:$0 sm:$0xff]  ;;  %v167_v10 = vld.sshfl [vmem:[#allocation1 + $0x28] sm:$0xff pattern:$0x73625140]  ;;  %s493_s4 = smov 96  }
  0x2f   :  { %264 = vmatpush.msrb.mxu0 %v99_v26  ;;  %283 = vmatpush.msrb.mxu1 %v116_v27  ;;  %v166_v7 = vld.sshfl [vmem:[#allocation1 + $0x20] sm:$0xff pattern:$0x73625140]  ;;  %v478_v11 = vld [vmem:[%s949_s3 + $0x8] sm:$0xff] }
  0x30   :  { %305 = vmatpush.msrb.mxu2 %v130_v28  ;;  %324 = vmatpush.msrb.mxu3 %v147_v29  ;;  %v106_v9 = vld [vmem:[%s946_s2 + $0x280] sm:$0xff]  ;;  %s494_s2 = smov 120  }
  0x31   :  { %265 = vmatpush.msrb.mxu0 %v98_v30  ;;  %284 = vmatpush.msrb.mxu1 %v115_v31  ;;  %v24_v12 = vld [vmem:[%s950_s1] sm:$0x3]  ;;  %s495_s1 = smov 112  }
  0x32   :  { %306 = vmatpush.msrb.mxu2 %v129_v32  ;;  %325 = vmatpush.msrb.mxu3 %v146_v33  ;;  %v339_v13 = vld [vmem:[%s949_s3] sm:$0xff]  ;;  %s496_s3 = smov 16  }
  0x33   :  { %266 = vmatpush.msrb.mxu0 %v97_v34  ;;  %285 = vmatpush.msrb.mxu1 %v114_v35 }
  0x34   :  { %307 = vmatpush.msrb.mxu2 %v128_v36  ;;  %326 = vmatpush.msrb.mxu3 %v145_v37 }
  0x35   :  { %267 = vmatpush.msrb.mxu0 %v96_v38  ;;  %286 = vmatpush.msrb.mxu1 %v113_v39 }
  0x36   :  { %308 = vmatpush.msrb.mxu2 %v127_v40  ;;  %327 = vmatpush.msrb.mxu3 %v144_v41 }
  0x37   :  { %268 = vmatpush.msrb.mxu0 %v95_v42  ;;  %287 = vmatpush.msrb.mxu1 %v112_v43 }
  0x38   :  { %309 = vmatpush.msrb.mxu2 %v126_v44  ;;  %328 = vmatpush.msrb.mxu3 %v143_v45 }
  0x39   :  { %234 = vmatmul.f32.vlgmr.msra.gmra.mxu2 %v164_v46  ;;  %269 = vmatpush.msrb.mxu0 %v94_v47 }
  0x3a   :  { %288 = vmatpush.msrb.mxu1 %v111_v48  ;;  %310 = vmatpush.msrb.mxu2 %v125_v49 }
  0x3b   :  { %329 = vmatpush.msrb.mxu3 %v142_v50  ;;  %194 = vmatmul.f32.vlgmr.msra.gmra.mxu0 %v162_v51 }
  0x3c   :  { %254 = vmatmul.f32.vlgmr.msra.gmra.mxu3 %v165_v52  ;;  %270 = vmatpush.msrb.mxu0 %v93_v53 }
  0x3d   :  { %289 = vmatpush.msrb.mxu1 %v110_v54  ;;  %311 = vmatpush.msrb.mxu2 %v124_v55 }
  0x3e   :  { %330 = vmatpush.msrb.mxu3 %v141_v56  ;;  %214 = vmatmul.f32.vlgmr.msra.gmra.mxu1 %v163_v57  ;;  %v443_v56 = vlaneseq }
  0x3f   :  { %271 = vmatpush.msrb.mxu0 %v92_v58  ;;  %290 = vmatpush.msrb.mxu1 %v109_v59 }
  0x40   :  { %312 = vmatpush.msrb.mxu2 %v123_v60  ;;  %331 = vmatpush.msrb.mxu3 %v140_v61  ;;  %v444_v57 = vand.u32 127, %v443_v56 }
  0x41   :  { %272 = vmatpush.msrb.mxu0 %v91_v62  ;;  %291 = vmatpush.msrb.mxu1 %v108_v63 }
  0x42   :  { %313 = vmatpush.msrb.mxu2 %v122_v0  ;;  %332 = vmatpush.msrb.mxu3 %v139_v1 }
  0x43   :  { %314 = vmatmul.f32.vlgmr.msrb.gmra.mxu2 %v168_v2  ;;  %273 = vmatpush.msrb.mxu0 %v90_v3 }
  0x44   :  { %292 = vmatpush.msrb.mxu1 %v107_v4  ;;  %333 = vmatpush.msrb.mxu3 %v138_v5 }
  0x45   :  { %274 = vmatmul.f32.vlgmr.msrb.gmra.mxu0 %v166_v7  ;;  %334 = vmatmul.f32.vlgmr.msrb.gmra.mxu3 %v169_v8 }
  0x46   :  { %293 = vmatpush.msrb.mxu1 %v106_v9  ;;  %369 = vrot.lane.b32.xlu0 %v486_v6, %s493_s4 }
  0x47   :  { %294 = vmatmul.f32.vlgmr.msrb.gmra.mxu1 %v167_v10  ;;  %362 = vmatpush.msra.mxu0 %v339_v13 }
  0x48   :  { %390 = vmatpush.msra.mxu1 %v478_v11 }
  0x4e   :  { %340 = vrot.lane.b32.xlu0 %v486_v6, %s494_s2 }
  0x4f   :  { %479 = vmatmul.msk.f32.vlgmr.msra.gmra.mxu1 %vm343_vm0, %v24_v12 }
  0xb8   :  { %v195_v14 = vpop.f32.mrf.mxu0  ;;  %v370_v30 = vpop.permute.xlu0 %369 }
  0xb9   :  { %v196_v15 = vadd.f32 %v486_v6, %v195_v14 }
  0xbb   :  { %v215_v16 = vpop.f32.mrf.mxu1 }
  0xbc   :  { %v216_v17 = vadd.f32 %v215_v16, %v196_v15  ;;  %v235_v18 = vpop.f32.mrf.mxu2 }
  0xbe   :  { %v236_v19 = vadd.f32 %v235_v18, %v216_v17 }
  0xbf   :  { %v255_v20 = vpop.f32.mrf.mxu3 }
  0xc0   :  { %v256_v21 = vadd.f32 %v255_v20, %v236_v19  ;;  %v341_v34 = vpop.permute.xlu0 %340 }
  0xc2   :  { %v275_v22 = vpop.f32.mrf.mxu0 }
  0xc3   :  { %v276_v23 = vadd.f32 %v275_v22, %v256_v21 }
  0xc4   :  { %v295_v24 = vpop.f32.mrf.mxu1 }
  0xc5   :  { %v296_v25 = vadd.f32 %v295_v24, %v276_v23 }
  0xc6   :  { %v315_v26 = vpop.f32.mrf.mxu2 }
  0xc7   :  { %v316_v27 = vadd.f32 %v315_v26, %v296_v25 }
  0xc8   :  { %v335_v28 = vpop.f32.mrf.mxu3 }
  0xc9   :  { %v336_v29 = vadd.f32 %v335_v28, %v316_v27 }
  0xcb   :  { %v338_v31 = vmax.f32 %v336_v29, 0.0 }
  0xcc   :  { %v392_v32 = vpop.f32.mrf.mxu1 }
  0xcd   :  { %477 = vmatmul.msk.f32.vlgmr.msra.gmra.mxu0 %vm343_vm0, %v338_v31  ;;  %v393_v33 = vadd.f32 %v392_v32, %v370_v30 }
  0xcf   :  { %416 = vrot.lane.b32.xlu1 %v393_v33, %s495_s1 }
 0x141   :  { %v417_v48 = vpop.permute.xlu1 %416 }
 0x14a   :  { %v364_v35 = vpop.f32.mrf.mxu0 }
 0x14b   :  { %v365_v36 = vadd.f32 %v364_v35, %v341_v34 }
 0x14d   :  { %v395_v37 = vadd.f32 %v393_v33, %v365_v36 }
 0x14f   :  { %v480_v38 = vmul.f32 -1.442695, %v395_v37 }
 0x151   :  { %487 = vpow2.f32 %v480_v38 }
 0x157   :  { %v488_v39 = vpop.eup %487 }
 0x158   :  { %v399_v40 = vadd.f32 1.0, %v488_v39 }
 0x15a   :  { %489 = vrcp.f32 %v399_v40  ;;  %v411_v44 = vand.u32 2147483648, %v399_v40  ;;  %v409_v46 = vand.u32 2147483647, %v399_v40  ;;  %vm405_vm2 = vweird.f32 %v399_v40 }
 0x15c   :  { %v412_v49 = vor.u32 1.1754944e-38, %v411_v44  ;;  %vm410_vm4 = vcmp.eq.f32.partialorder %v409_v46, 8.507059e+37 }
 0x160   :  { %v490_v41 = vpop.eup %489 }
 0x161   :  { %v401_v42 = vmul.f32 %v490_v41, %v399_v40  ;;  %vm406_vm1 = vweird.f32 %v490_v41 }
 0x162   :  { %vm407_vm3 = vmor %vm405_vm2, %vm406_vm1 }
 0x163   :  { %v402_v43 = vsub.f32 1.0, %v401_v42 }
 0x165   :  { %v403_v45 = vmul.f32 %v490_v41, %v402_v43 }
 0x167   :  { %v404_v47 = vadd.f32 %v490_v41, %v403_v45 }
 0x169   :  { %v408_v50 = vsel %vm407_vm3, %v490_v41, %v404_v47 }
 0x16a   :  { %v413_v51 = vsel %vm410_vm4, %v412_v49, %v408_v50 }
 0x16b   :  { %v419_v52 = vmul.f32 %v417_v48, %v413_v51  ;;  %v426_v59 = vsub.f32 1.0, %v413_v51 }
 0x16d   :  { %421 = vrot.lane.b32.xlu1 %v419_v52, %s496_s3 }
 0x175   :  { %450 = vrot.lane.b32.xlu1 %v444_v57, %s497_s21 }
 0x1df   :  { %v422_v53 = vpop.permute.xlu1 %421 }
 0x1e0   :  { %v424_v54 = vadd.f32 %v422_v53, %v365_v36 }
 0x1e2   :  { %491 = vtanh.f32 %v424_v54 }
 0x1e7   :  { %v451_v1 = vpop.permute.xlu1 %450 }
 0x1e8   :  { %v492_v55 = vpop.eup %491 }
 0x1e9   :  { %428 = vrot.lane.b32.xlu2 %v492_v55, %s494_s2 }
 0x1f1   :  { %432 = vrot.lane.b32.xlu2 %v24_v12, %s497_s21 }
 0x243   :  { %v429_v58 = vpop.permute.xlu2 %428 }
 0x244   :  { %v431_v61 = vmul.f32 %v429_v58, %v426_v59 }
 0x24b   :  { %v433_v60 = vpop.permute.xlu2 %432 }
 0x24c   :  { %v435_v62 = vmul.f32 %v433_v60, %v413_v51 }
 0x24e   :  { %v436_v63 = vadd.f32 %v435_v62, %v431_v61 }
 0x250   :  { %v446_v0 = vsel %vm445_vm5, %v436_v63, -inf }
 0x251   :  { %447 = vmax.xlane.f32.xlu0 %v446_v0 }
 0x2c4   :  { %v448_v2 = vpop.xlane.xlu0 %447 }
 0x2c5   :  { %vm449_vm6 = vcmp.eq.f32.partialorder %v436_v63, %v448_v2 }
 0x2c6   :  { %v452_v3 = vsel %vm449_vm6, %v451_v1, 8 }
 0x2c7   :  { %v453_v4 = vsel %vm445_vm5, %v452_v3, 2147483647 }
 0x2c8   :  { %v455_v5 = vshra.s32 %v453_v4, 16  ;;  %v454_v7 = vand.u32 65535, %v453_v4 }
 0x2ca   :  { %v457_v6 = vcvt.s32.f32 %v455_v5  ;;  %v456_v9 = vcvt.s32.f32 %v454_v7 }
 0x2cc   :  { %458 = vmin.xlane.f32.xlu2 %v457_v6 }
 0x2e4   :  { %438 = vrot.lane.b32.xlu2 %v436_v63, %s494_s2 }
 0x33f   :  { %v459_v8 = vpop.xlane.xlu2 %458 }
 0x340   :  { %vm460_vm7 = vcmp.eq.f32.partialorder %v457_v6, %v459_v8  ;;  %v465_v12 = vcvt.f32.s32 %v459_v8 }
 0x341   :  { %v461_v10 = vsel %vm460_vm7, %v456_v9, inf }
 0x342   :  { %462 = vmin.xlane.f32.xlu1 %v461_v10  ;;  %v466_v14 = vshll.u32 %v465_v12, 16 }
 0x347   :  { %v439_v11 = vpop.permute.xlu2 %438 }
 0x348   :  { %442 = vst.msk [vmem:[%s951_s6] sm:$0x3] %vm441_vm8, %v439_v11 }
 0x3b5   :  { %v463_v13 = vpop.xlane.xlu1 %462 }
 0x3b6   :  { %v464_v15 = vcvt.f32.s32 %v463_v13 }
 0x3b8   :  { %v467_v16 = vadd.s32 %v466_v14, %v464_v15 }
 0x3ba   :  { %468 = vst [vmem:[%s952_s5] sm:$0x3] %v467_v16 }

</bundles_post_ra>
